<compile_context>
chip_gen: v7x
topology: tpu7x:2x2x1
jax: 0.10.0
libtpu: 0.0.40
codegen_flags: <defaults>
</compile_context>

<pallas_src>
import functools

import jax
import jax.numpy as jnp
from jax.experimental import pallas as pl
from jax.experimental.pallas import tpu as pltpu

_EPS = 1e-5
_LANES = 128
_TILE_ROWS = 4096                 # 2 MiB f32 per input per block
_SINGLE_STEP_MAX_ROWS = _TILE_ROWS
_VMEM_LIMIT = 32 * 1024 * 1024    # safe on v5e/v6e/v7x


def _cdiv(a, b):
    return -(-a // b)


def _sigmoid_f32(x):
    # Single-transcendental sigmoid: one EUP tanh per vreg + 2 VALU ops.
    x = x.astype(jnp.float32)
    return 0.5 * jnp.tanh(0.5 * x) + 0.5


# --------------------------------------------------------------------------
# Single-step path: whole (rows, 128) slab in one block.
# --------------------------------------------------------------------------
def _dice_single_kernel(pred_ref, tgt_ref, inter_ref, union_ref):
    p = _sigmoid_f32(pred_ref[...])
    t = tgt_ref[...].astype(jnp.float32)
    inter_ref[...] = jnp.full((1, 1), jnp.sum(p * t), dtype=jnp.float32)
    union_ref[...] = jnp.full((1, 1), jnp.sum(p + t), dtype=jnp.float32)


def _dice_partials_single(p2, t2):
    rows = p2.shape[0]
    inter, union = pl.pallas_call(
        _dice_single_kernel,
        out_shape=(jax.ShapeDtypeStruct((1, 1), jnp.float32),
                   jax.ShapeDtypeStruct((1, 1), jnp.float32)),
        grid_spec=pltpu.PrefetchScalarGridSpec(
            num_scalar_prefetch=0,
            grid=(1,),
            in_specs=[pl.BlockSpec((rows, _LANES), lambda i: (0, 0)),
                      pl.BlockSpec((rows, _LANES), lambda i: (0, 0))],
            out_specs=(pl.BlockSpec((1, 1), lambda i: (0, 0)),
                       pl.BlockSpec((1, 1), lambda i: (0, 0))),
        ),
        compiler_params=pltpu.CompilerParams(
            dimension_semantics=("arbitrary",),
            vmem_limit_bytes=_VMEM_LIMIT),
    )(p2, t2)
    return jnp.sum(inter), jnp.sum(union)


# --------------------------------------------------------------------------
# Tiled path: (2 cores, n_tiles_per_core) grid, (8, 128) accumulators.
# --------------------------------------------------------------------------
def _dice_tiled_kernel(pred_ref, tgt_ref, inter_out, union_out,
                       inter_acc, union_acc, *, n_per_core, rows):
    c = pl.program_id(0)   # "parallel": one per TensorCore on v7x
    t = pl.program_id(1)   # "arbitrary": reduction steps within a core

    @pl.when(t == 0)
    def _():
        inter_acc[...] = jnp.zeros_like(inter_acc)
        union_acc[...] = jnp.zeros_like(union_acc)

    p = _sigmoid_f32(pred_ref[...])
    tg = tgt_ref[...].astype(jnp.float32)
    inter_v = p * tg
    union_v = p + tg

    def accumulate(iv, uv):
        # Leading-axis partial reduce (VALU-only) into small accumulators:
        # no full-block accumulator read-modify-write per step.
        inter_acc[...] += iv.reshape(_TILE_ROWS // 8, 8, _LANES).sum(axis=0)
        union_acc[...] += uv.reshape(_TILE_ROWS // 8, 8, _LANES).sum(axis=0)

    last_full_tile = rows // _TILE_ROWS               # static
    needs_mask = (2 * n_per_core * _TILE_ROWS != rows)  # static

    if needs_mask:
        logical = c * n_per_core + t                  # traced tile index

        @pl.when(logical < last_full_tile)
        def _():  # completely valid tile -> unmasked fast path
            accumulate(inter_v, union_v)

        @pl.when(logical >= last_full_tile)
        def _():  # ragged last tile or fully-masked phantom tile
            row = jax.lax.broadcasted_iota(jnp.int32, (_TILE_ROWS, _LANES), 0)
            valid = (logical * _TILE_ROWS + row) < rows   # row-level: no
            # flat-index int32 overflow.  where() *selects* so garbage in the
            # out-of-bounds part of the boundary block is discarded.
            accumulate(jnp.where(valid, inter_v, 0.0),
                       jnp.where(valid, union_v, 0.0))
    else:
        accumulate(inter_v, union_v)

    @pl.when(t == pl.num_programs(1) - 1)
    def _():
        inter_out[0] = inter_acc[...]
        union_out[0] = union_acc[...]


def _dice_partials_tiled(p2, t2):
    rows = p2.shape[0]
    assert rows < 2**31  # row-index mask arithmetic is int32
    n_tiles = _cdiv(rows, _TILE_ROWS)
    n_per_core = _cdiv(n_tiles, 2)
    has_phantom = (2 * n_per_core != n_tiles)

    def in_index(c, t):
        idx = c * n_per_core + t
        if has_phantom:
            # Phantom tiles re-read the last real tile (fully masked out in
            # the kernel) so no out-of-range block index is ever presented.
            idx = jnp.minimum(idx, n_tiles - 1)
        return (idx, 0)

    kernel = functools.partial(_dice_tiled_kernel,
                               n_per_core=n_per_core, rows=rows)
    inter, union = pl.pallas_call(
        kernel,
        out_shape=(jax.ShapeDtypeStruct((2, 8, _LANES), jnp.float32),
                   jax.ShapeDtypeStruct((2, 8, _LANES), jnp.float32)),
        grid_spec=pltpu.PrefetchScalarGridSpec(
            num_scalar_prefetch=0,
            grid=(2, n_per_core),
            in_specs=[pl.BlockSpec((_TILE_ROWS, _LANES), in_index),
                      pl.BlockSpec((_TILE_ROWS, _LANES), in_index)],
            out_specs=(pl.BlockSpec((1, 8, _LANES), lambda c, t: (c, 0, 0)),
                       pl.BlockSpec((1, 8, _LANES), lambda c, t: (c, 0, 0))),
            scratch_shapes=[pltpu.VMEM((8, _LANES), jnp.float32),
                            pltpu.VMEM((8, _LANES), jnp.float32)],
        ),
        compiler_params=pltpu.CompilerParams(
            dimension_semantics=("parallel", "arbitrary"),
            vmem_limit_bytes=_VMEM_LIMIT),
    )(p2, t2)
    return jnp.sum(inter), jnp.sum(union)


# --------------------------------------------------------------------------
# Public wrapper (forward pass of DiceLoss).
# --------------------------------------------------------------------------
def dice_loss(predict, target):
    assert predict.shape == target.shape, (
        "the size of predict and target must be equal.")

    n_valid = predict.size
    flat_p = predict.reshape(-1)
    flat_t = target.reshape(-1)

    rows = n_valid // _LANES
    tail = n_valid - rows * _LANES

    # <128-element ragged tail: plain jnp on the tail slice only.
    if tail:
        tp = _sigmoid_f32(flat_p[rows * _LANES:])
        tt = flat_t[rows * _LANES:].astype(jnp.float32)
        tail_inter = jnp.sum(tp * tt)
        tail_union = jnp.sum(tp + tt)
    else:
        tail_inter = jnp.float32(0.0)
        tail_union = jnp.float32(0.0)

    if rows == 0:
        inter, union = tail_inter, tail_union
    else:
        # Lane-aligned prefix as a (rows, 128) slab.  Metadata-only when the
        # element count is lane aligned (the common NCHW-mask case).
        # TODO(synk): a fully zero-copy path for lane-unaligned inputs would
        # need a pl.ANY + manual-DMA kernel; the prefix slice is acceptable.
        p2 = flat_p[:rows * _LANES].reshape(rows, _LANES)
        t2 = flat_t[:rows * _LANES].reshape(rows, _LANES)
        if rows <= _SINGLE_STEP_MAX_ROWS:
            k_inter, k_union = _dice_partials_single(p2, t2)
        else:
            k_inter, k_union = _dice_partials_tiled(p2, t2)
        inter = k_inter + tail_inter
        union = k_union + tail_union

    return 1.0 - 2.0 * (inter + _EPS) / (union + _EPS)


def _dice_loss_ref(predict, target):
    num = predict.shape[0]
    pre = jax.nn.sigmoid(predict.astype(jnp.float32)).reshape(num, -1)
    tar = target.astype(jnp.float32).reshape(num, -1)
    intersection = (pre * tar).sum(-1).sum()
    union = (pre + tar).sum(-1).sum()
    return 1.0 - 2.0 * (intersection + _EPS) / (union + _EPS)


if __name__ == "__main__":
    key = jax.random.PRNGKey(0)
    kp, kt, kp2, kt2, kp3, kt3 = jax.random.split(key, 6)

    # Primary small example: mask-head-like NCHW logits + binary targets.
    predict = jax.random.normal(kp, (2, 4, 16, 16), dtype=jnp.float32)
    target = (jax.random.uniform(kt, (2, 4, 16, 16)) > 0.5).astype(jnp.float32)
    out = jax.block_until_ready(dice_loss(predict, target))
    ref = _dice_loss_ref(predict, target)
    assert jnp.allclose(out, ref, atol=1e-5, rtol=1e-5), (out, ref)

    # Lane-unaligned element count (exercises the wrapper-side tail path).
    p_small = jax.random.normal(kp2, (2, 3, 7, 5), dtype=jnp.float32)
    t_small = (jax.random.uniform(kt2, (2, 3, 7, 5)) > 0.5).astype(jnp.float32)
    out2 = jax.block_until_ready(dice_loss(p_small, t_small))
    ref2 = _dice_loss_ref(p_small, t_small)
    assert jnp.allclose(out2, ref2, atol=1e-5, rtol=1e-5), (out2, ref2)

    # Larger input: exercises the tiled two-core path (full tiles, one ragged
    # last tile, one fully-masked phantom tile) with a bf16 predict stream.
    p_big = jax.random.normal(kp3, (4, 10, 160, 164), dtype=jnp.bfloat16)
    t_big = (jax.random.uniform(kt3, (4, 10, 160, 164)) > 0.5).astype(jnp.float32)
    out3 = jax.block_until_ready(dice_loss(p_big, t_big))
    ref3 = _dice_loss_ref(p_big, t_big)
    assert jnp.allclose(out3, ref3, atol=1e-4, rtol=1e-4), (out3, ref3)

    print("KERNEL_OK")
</pallas_src>

<mosaic_0001>
module attributes {stable_mosaic.version = 11 : i64} {
  func.func @_dice_single_kernel(%arg0: i32, %arg1: memref<16x128xf32, #tpu.memory_space<vmem>>, %arg2: memref<16x128xf32, #tpu.memory_space<vmem>>, %arg3: memref<1x1xf32, #tpu.memory_space<vmem>>, %arg4: memref<1x1xf32, #tpu.memory_space<vmem>>) attributes {dimension_semantics = [#tpu.dimension_semantics<arbitrary>], iteration_bounds = array<i64: 1>, scalar_prefetch = 0 : i64, scratch_operands = 0 : i64, tpu.core_type = #tpu.core_type<tc>, window_params = [{pipeline_mode = #tpu.pipeline_mode<synchronous>, transform_indices = @transform_0, window_bounds = array<i64: 16, 128>}, {pipeline_mode = #tpu.pipeline_mode<synchronous>, transform_indices = @transform_1, window_bounds = array<i64: 16, 128>}, {pipeline_mode = #tpu.pipeline_mode<synchronous>, transform_indices = @transform_2, window_bounds = array<i64: 1, 1>}, {pipeline_mode = #tpu.pipeline_mode<synchronous>, transform_indices = @transform_3, window_bounds = array<i64: 1, 1>}]} {
    %c0 = arith.constant 0 : index
    %c0_0 = arith.constant 0 : index
    %0 = vector.load %arg1[%c0, %c0_0] : memref<16x128xf32, #tpu.memory_space<vmem>>, vector<16x128xf32>
    %cst = arith.constant 5.000000e-01 : f32
    %1 = vector.broadcast %cst : f32 to vector<16x128xf32>
    %2 = arith.mulf %1, %0 : vector<16x128xf32>
    %3 = math.tanh %2 : vector<16x128xf32>
    %cst_1 = arith.constant 5.000000e-01 : f32
    %4 = vector.broadcast %cst_1 : f32 to vector<16x128xf32>
    %5 = arith.mulf %4, %3 : vector<16x128xf32>
    %cst_2 = arith.constant 5.000000e-01 : f32
    %6 = vector.broadcast %cst_2 : f32 to vector<16x128xf32>
    %7 = arith.addf %5, %6 : vector<16x128xf32>
    %c0_3 = arith.constant 0 : index
    %c0_4 = arith.constant 0 : index
    %8 = vector.load %arg2[%c0_3, %c0_4] : memref<16x128xf32, #tpu.memory_space<vmem>>, vector<16x128xf32>
    %9 = arith.mulf %7, %8 : vector<16x128xf32>
    %10 = vector.shape_cast %9 : vector<16x128xf32> to vector<1x16x128xf32>
    %cst_5 = arith.constant dense<0.000000e+00> : vector<1xf32>
    %11 = vector.multi_reduction <add>, %10, %cst_5 [1, 2] : vector<1x16x128xf32> to vector<1xf32>
    %12 = vector.shape_cast %11 : vector<1xf32> to vector<1x1x1xf32>
    %13 = vector.extract %12[0, 0, 0] : f32 from vector<1x1x1xf32>
    %14 = vector.broadcast %13 : f32 to vector<1x1xf32>
    %c0_6 = arith.constant 0 : index
    %c0_7 = arith.constant 0 : index
    %15 = vector.load %arg3[%c0_6, %c0_7] : memref<1x1xf32, #tpu.memory_space<vmem>>, vector<1x1xf32>
    tpu.vector_store %arg3[%c0_6, %c0_7], %14 {strides = array<i32>} : memref<1x1xf32, #tpu.memory_space<vmem>>, vector<1x1xf32>,
    %16 = arith.addf %7, %8 : vector<16x128xf32>
    %17 = vector.shape_cast %16 : vector<16x128xf32> to vector<1x16x128xf32>
    %cst_8 = arith.constant dense<0.000000e+00> : vector<1xf32>
    %18 = vector.multi_reduction <add>, %17, %cst_8 [1, 2] : vector<1x16x128xf32> to vector<1xf32>
    %19 = vector.shape_cast %18 : vector<1xf32> to vector<1x1x1xf32>
    %20 = vector.extract %19[0, 0, 0] : f32 from vector<1x1x1xf32>
    %21 = vector.broadcast %20 : f32 to vector<1x1xf32>
    %c0_9 = arith.constant 0 : index
    %c0_10 = arith.constant 0 : index
    %22 = vector.load %arg4[%c0_9, %c0_10] : memref<1x1xf32, #tpu.memory_space<vmem>>, vector<1x1xf32>
    tpu.vector_store %arg4[%c0_9, %c0_10], %21 {strides = array<i32>} : memref<1x1xf32, #tpu.memory_space<vmem>>, vector<1x1xf32>,
    return
  }
  func.func @transform_0(%arg0: i32) -> (i32, i32) {
    %c0_i32 = arith.constant 0 : i32
    %c0_i32_0 = arith.constant 0 : i32
    %c0_i32_1 = arith.constant 0 : i32
    return %c0_i32, %c0_i32_0 : i32, i32
  }
  func.func @transform_1(%arg0: i32) -> (i32, i32) {
    %c0_i32 = arith.constant 0 : i32
    %c0_i32_0 = arith.constant 0 : i32
    %c0_i32_1 = arith.constant 0 : i32
    return %c0_i32, %c0_i32_0 : i32, i32
  }
  func.func @transform_2(%arg0: i32) -> (i32, i32) {
    %c0_i32 = arith.constant 0 : i32
    %c0_i32_0 = arith.constant 0 : i32
    %c0_i32_1 = arith.constant 0 : i32
    return %c0_i32, %c0_i32_0 : i32, i32
  }
  func.func @transform_3(%arg0: i32) -> (i32, i32) {
    %c0_i32 = arith.constant 0 : i32
    %c0_i32_0 = arith.constant 0 : i32
    %c0_i32_1 = arith.constant 0 : i32
    return %c0_i32, %c0_i32_0 : i32, i32
  }
}

</mosaic_0001>

<bundles_post_ra>
// kernel: tpu_custom_call.1
= control target key start
LH: loop header
LB: loop body
LE: loop exit
PB: predicated region body
PF: predicated region fallthrough
CT: control target
= control target key end

     0   :  { %9 = vsyncpa [#allocation3], 0  ;;  %s300_s0 = inlined_call_operand.hbm [shape: f32[16,128], index: 0, kind: input, shape index: {}]   ;;  %s301_s1 = inlined_call_operand.hbm [shape: f32[16,128], index: 1, kind: input, shape index: {}]   ;;  %s302_s2 = inlined_call_operand.hbm [shape: f32[1,1], index: 2, kind: output, shape index: {0}]   ;;  %s303_s3 = inlined_call_operand.hbm [shape: f32[1,1], index: 3, kind: output, shape index: {1}]  }
   0x1   :  { %10 = vsyncpa [#allocation6], 0 }
   0x2   :  { %11 = vsyncpa [#allocation4], 0 }
   0x3   :  { %12 = vsyncpa [#allocation9], 0  ;;  %s224_s12 = smov [#allocation2]   ;;  %s128_s16 = scalar_lea.hbm %s300_s0, 256 }
   0x4   :  { %s18_s13 = sshll.u32 %s224_s12, 4  ;;  %p129_p0 = scmp.ne.s32.totalorder %s300_s0, %s128_s16  ;;  %s19_s13 = int_to_ptr.vmem [resolvable:$true] %s18_s13 }
   0x5   :  { %p132_p1 = scmp.lt.u32.totalorder %s128_s16, %s300_s0 }
   0x7   :  { %p134_p2 = pnand %p132_p1, %p129_p0 }
   0x9   :  { %137 = shalt.err (!%p134_p2)
}
   0xa   :  { %s138_s21 = scalar_lea.vmem %s19_s13, 256  ;;  %p143_p4 = scmp.lt.s32.totalorder %s19_s13, %s19_s13 }
   0xb   :  { %p139_p3 = scmp.ne.s32.totalorder %s19_s13, %s138_s21  ;;  %p144_p5 = scmp.lt.s32.totalorder %s138_s21, %s138_s21 }
   0xd   :  { %p145_p6 = por %p144_p5, %p143_p4 }
   0xf   :  { %p146_p7 = pnand %p145_p6, %p139_p3 }
  0x11   :  { %149 = shalt.err (!%p146_p7)
}
  0x12   :  { %s225_s22 = smov 128   ;;  %s226_s23 = smov 8  }
  0x13   :  { %24 = dma.hbm_to_vmem [thread:$0]  %s300_s0, 256, %s19_s13, [#allocation3], %s225_s22, %s225_s22, %s226_s23  }
  0x14   :  { %s227_s26 = smov [#allocation5]   ;;  %s150_s30 = scalar_lea.hbm %s301_s1, 256 }
  0x15   :  { %s30_s27 = sshll.u32 %s227_s26, 4  ;;  %p151_p8 = scmp.ne.s32.totalorder %s301_s1, %s150_s30  ;;  %s31_s27 = int_to_ptr.vmem [resolvable:$true] %s30_s27 }
  0x16   :  { %p154_p9 = scmp.lt.u32.totalorder %s150_s30, %s301_s1 }
  0x18   :  { %p156_p10 = pnand %p154_p9, %p151_p8 }
  0x1a   :  { %159 = shalt.err (!%p156_p10)
}
  0x1b   :  { %s160_s8 = scalar_lea.vmem %s31_s27, 256  ;;  %p165_p12 = scmp.lt.s32.totalorder %s31_s27, %s31_s27 }
  0x1c   :  { %p161_p11 = scmp.ne.s32.totalorder %s31_s27, %s160_s8  ;;  %p166_p13 = scmp.lt.s32.totalorder %s160_s8, %s160_s8 }
  0x1e   :  { %p167_p0 = por %p166_p13, %p165_p12 }
  0x20   :  { %p168_p1 = pnand %p167_p0, %p161_p11 }
  0x22   :  { %171 = shalt.err (!%p168_p1)
}
  0x23   :  { %36 = dma.hbm_to_vmem [thread:$0]  %s301_s1, 256, %s31_s27, [#allocation6], %s225_s22, %s225_s22, %s226_s23  }
  0x24   :  { %216 = dma.done.wait [#allocation3], 256  }
  0x25   :  { %217 = vsyncadd [#allocation3], 4294967040 }
  0x26   :  { %218 = dma.done.wait [#allocation6], 256  }
  0x27   :  { %219 = vsyncadd [#allocation6], 4294967040  ;;  %v43_v0 = vld [vmem:[#allocation2] sm:$0xff]  ;;  %v44_v1 = vld [vmem:[#allocation2 + $0x8] sm:$0xff]  ;;  %s228_s1 = smov [#allocation7]   ;;  %vm68_vm0 = vcmask 0  }
  0x28   :  { %v45_v2 = vmul.f32 0.5, %v43_v0  ;;  %v46_v3 = vmul.f32 0.5, %v44_v1  ;;  %v53_v8 = vld [vmem:[#allocation5] sm:$0xff]  ;;  %v54_v10 = vld [vmem:[#allocation5 + $0x8] sm:$0xff]  ;;  %s90_s10 = sshll.u32 %s228_s1, 4  ;;  %s229_s12 = smov [#allocation8]   ;;  %s91_s10 = int_to_ptr.vmem [resolvable:$true] %s90_s10 }
  0x29   :  { %s100_s13 = sshll.u32 %s229_s12, 4  ;;  %s172_s14 = scalar_lea.vmem %s91_s10, 16  ;;  %s101_s13 = int_to_ptr.vmem [resolvable:$true] %s100_s13 }
  0x2a   :  { %124 = vtanh.f32 %v45_v2  ;;  %p173_p2 = scmp.ne.s32.totalorder %s91_s10, %s172_s14  ;;  %s176_s15 = scalar_lea.vmem %s91_s10, 32 }
  0x2b   :  { %126 = vtanh.f32 %v46_v3  ;;  %p177_p3 = scmp.lt.s32.totalorder %s91_s10, %s91_s10  ;;  %p178_p4 = scmp.lt.s32.totalorder %s176_s15, %s172_s14 }
  0x2d   :  { %p179_p5 = por %p178_p4, %p177_p3 }
  0x2f   :  { %p180_p6 = pnand %p179_p5, %p173_p2 }
  0x34   :  { %v125_v4 = vpop.eup %124 }
  0x35   :  { %v127_v5 = vpop.eup %126  ;;  %v49_v6 = vmul.f32 0.5, %v125_v4 }
  0x36   :  { %v50_v7 = vmul.f32 0.5, %v127_v5 }
  0x37   :  { %v51_v9 = vadd.f32 0.5, %v49_v6 }
  0x38   :  { %v52_v11 = vadd.f32 0.5, %v50_v7 }
  0x39   :  { %v55_v12 = vmul.f32 %v53_v8, %v51_v9  ;;  %v70_v14 = vadd.f32 %v53_v8, %v51_v9 }
  0x3a   :  { %v56_v13 = vmul.f32 %v54_v10, %v52_v11  ;;  %v71_v15 = vadd.f32 %v54_v10, %v52_v11 }
  0x3c   :  { %v57_v16 = vadd.f32 %v56_v13, %v55_v12  ;;  %v72_v17 = vadd.f32 %v71_v15, %v70_v14 }
  0x3e   :  { %58 = vadd.xlane.f32.xlu0 %v57_v16 }
  0x42   :  { %73 = vadd.xlane.f32.xlu0 %v72_v17 }
  0xcb   :  { %v59_v18 = vpop.xlane.xlu0 %58 }
  0xcc   :  { %v60_v19 = vrot.slane %v59_v18, 4 }
  0xce   :  { %v61_v20 = vadd.f32 %v60_v19, %v59_v18 }
  0xcf   :  { %v74_v21 = vpop.xlane.xlu0 %73 }
  0xd0   :  { %v62_v22 = vrot.slane %v61_v20, 2  ;;  %v75_v23 = vrot.slane %v74_v21, 4 }
  0xd2   :  { %v76_v24 = vadd.f32 %v75_v23, %v74_v21  ;;  %v63_v25 = vadd.f32 %v62_v22, %v61_v20 }
  0xd4   :  { %v77_v26 = vrot.slane %v76_v24, 2  ;;  %v64_v27 = vrot.slane %v63_v25, 1 }
  0xd6   :  { %v78_v28 = vadd.f32 %v77_v26, %v76_v24  ;;  %v65_v29 = vadd.f32 %v64_v27, %v63_v25 }
  0xd8   :  { %114 = vpush %v65_v29  ;;  %v79_v30 = vrot.slane %v78_v28, 1 }
  0xda   :  { %v80_v31 = vadd.f32 %v79_v30, %v78_v28 }
  0xdc   :  { %116 = vpush %v80_v31 }
 0x109   :  { %s115_s11 = spop %114 }
 0x10a   :  { %v67_v32 = vstv %s115_s11 }
 0x10b   :  { %69 = vst.msk [vmem:[#allocation7] sm:$0x1] %vm68_vm0, %v67_v32 }
 0x10c   :  { %183 = shalt.err (!%p180_p6)
}
 0x10d   :  { %s184_s18 = scalar_lea.hbm %s302_s2, 16 }
 0x10e   :  { %p185_p7 = scmp.ne.s32.totalorder %s302_s2, %s184_s18  ;;  %p188_p8 = scmp.lt.u32.totalorder %s184_s18, %s302_s2 }
 0x110   :  { %p190_p9 = pnand %p188_p8, %p185_p7 }
 0x112   :  { %193 = shalt.err (!%p190_p9)
}
 0x113   :  { %93 = dma.vmem_to_hbm [thread:$0]  %s91_s10, 16, %s302_s2, [#allocation4]  }
 0x114   :  { %s117_s25 = spop %116  ;;  %s194_s26 = scalar_lea.vmem %s101_s13, 16 }
 0x115   :  { %v82_v33 = vstv %s117_s25  ;;  %p195_p10 = scmp.ne.s32.totalorder %s101_s13, %s194_s26  ;;  %s198_s27 = scalar_lea.vmem %s101_s13, 32 }
 0x116   :  { %83 = vst.msk [vmem:[#allocation8] sm:$0x1] %vm68_vm0, %v82_v33  ;;  %p199_p11 = scmp.lt.s32.totalorder %s101_s13, %s101_s13  ;;  %p200_p12 = scmp.lt.s32.totalorder %s198_s27, %s194_s26 }
 0x118   :  { %p201_p13 = por %p200_p12, %p199_p11 }
 0x11a   :  { %p202_p0 = pnand %p201_p13, %p195_p10 }
 0x11c   :  { %205 = shalt.err (!%p202_p0)
}
 0x11d   :  { %s206_s30 = scalar_lea.hbm %s303_s3, 16 }
 0x11e   :  { %p207_p1 = scmp.ne.s32.totalorder %s303_s3, %s206_s30  ;;  %p210_p2 = scmp.lt.u32.totalorder %s206_s30, %s303_s3 }
 0x120   :  { %p212_p3 = pnand %p210_p2, %p207_p1 }
 0x122   :  { %215 = shalt.err (!%p212_p3)
}
 0x123   :  { %103 = dma.vmem_to_hbm [thread:$0]  %s101_s13, 16, %s303_s3, [#allocation9]  }
 0x124   :  { %220 = dma.done.wait [#allocation4], 16  }
 0x125   :  { %221 = vsyncadd [#allocation4], 4294967280 }
 0x126   :  { %222 = dma.done.wait [#allocation9], 16  }
 0x127   :  { %223 = vsyncadd [#allocation9], 4294967280 }
 0x128   :  { %110 = vsyncpa [#allocation3], 1 }
 0x129   :  { %111 = vsyncpa [#allocation6], 1 }
 0x12a   :  { %112 = vsyncpa [#allocation4], 1 }
 0x12b   :  { %113 = vsyncpa [#allocation9], 1 }

</bundles_post_ra>
